<compile_context>
chip_gen: v6e
topology: v6e:2x2x1
jax: 0.10.0
libtpu: 0.0.40
codegen_flags: <defaults>
</compile_context>

<pallas_src>
import functools

import jax
import jax.numpy as jnp
from jax.experimental import pallas as pl
from jax.experimental.pallas import tpu as pltpu

LEAKY_SLOPE = 0.1
LANE = 128

# flavor -> (base batch tile rows, VMEM budget bytes, bf16 VPU epilogue)
_FLAVOR_CFG = {
    "v5": (128, 100 * 1024 * 1024, False),
    "v6": (256, 100 * 1024 * 1024, True),
    "v7": (256, 56 * 1024 * 1024, True),
    "unknown": (128, 56 * 1024 * 1024, False),
}

_BUFFERED1_OK = None  # cached probe result


def _round_up(n, m):
    return ((n + m - 1) // m) * m


@functools.lru_cache(maxsize=1)
def _chip_flavor():
    try:
        kind = jax.devices()[0].device_kind.lower()
    except Exception:
        return "unknown"
    for tag in ("v7", "v6", "v5"):
        if tag in kind:
            return tag
    return "unknown"


def _buffered1_supported():
    """Probe ONCE whether pl.Buffered(1) (single-buffered resident weights) lowers."""
    global _BUFFERED1_OK
    if _BUFFERED1_OK is not None:
        return _BUFFERED1_OK
    if not hasattr(pl, "Buffered"):
        _BUFFERED1_OK = False
        return False

    def probe_kernel(a_ref, w_ref, o_ref):
        o_ref[...] = a_ref[...] + w_ref[...]

    try:
        a = jnp.zeros((32, 128), jnp.float32)
        w = jnp.zeros((16, 128), jnp.float32)
        out = pl.pallas_call(
            probe_kernel,
            out_shape=jax.ShapeDtypeStruct((32, 128), jnp.float32),
            grid=(2,),
            in_specs=[
                pl.BlockSpec((16, 128), lambda i: (i, 0)),
                pl.BlockSpec((16, 128), lambda i: (0, 0),
                             pipeline_mode=pl.Buffered(1)),
            ],
            out_specs=pl.BlockSpec((16, 128), lambda i: (i, 0)),
        )(a, w)
        jax.block_until_ready(out)
        _BUFFERED1_OK = True
    except Exception:
        # Narrow blast radius: only this tiny probe is guarded; the real kernel
        # runs with the known-good default double-buffering if this fails.
        _BUFFERED1_OK = False
    return _BUFFERED1_OK


def _vmem_estimate(tile_b, d_in_p, h1_p, h2_p, d_out_p, out_bytes, single_buffer):
    bf16_b, f32_b = 2, 4
    wbuf = 1 if single_buffer else 2
    weights = (d_in_p * h1_p + h1_p * h2_p + h2_p * d_out_p) * bf16_b * wbuf
    biases = (h1_p + h2_p + d_out_p) * f32_b * wbuf
    io = 2 * tile_b * d_in_p * bf16_b + 2 * tile_b * d_out_p * out_bytes
    acts = 3 * tile_b * max(h1_p, h2_p) * f32_b
    return weights + biases + io + acts


def mlp_kernel(x_ref, w1_ref, b1_ref, w2_ref, b2_ref, w3_ref, b3_ref, o_ref,
               *, bf16_epilogue):
    """Fused 3-layer MLP: bf16 MXU matmuls, f32 accumulation, LeakyReLU epilogue."""

    def act(h_f32):
        # Dropout: identity (eval mode).
        if bf16_epilogue:          # v6e/v7x: bf16 VPU -> halve VALU work
            h = h_f32.astype(jnp.bfloat16)
            return jnp.where(h >= 0, h, LEAKY_SLOPE * h)
        h = jnp.where(h_f32 >= 0.0, h_f32, LEAKY_SLOPE * h_f32)   # v5e: f32 VPU only
        return h.astype(jnp.bfloat16)

    x = x_ref[...]  # (tile_b, d_in_p) bf16

    h = act(jnp.dot(x, w1_ref[...], preferred_element_type=jnp.float32) + b1_ref[...])
    h = act(jnp.dot(h, w2_ref[...], preferred_element_type=jnp.float32) + b2_ref[...])
    out = jnp.dot(h, w3_ref[...], preferred_element_type=jnp.float32) + b3_ref[...]
    o_ref[...] = out.astype(o_ref.dtype)


def prepare_params(params):
    """One-time pad (lane-dense, multiples of 128) + f32->bf16 cast of the weights.

    Do this ONCE per parameter set; the per-call forward never touches the f32
    masters again (removes the per-call weight re-cast/re-pad HBM traffic).
    """
    w1, w2, w3 = params["w1"], params["w2"], params["w3"]
    b1 = params["b1"].reshape(1, -1)
    b2 = params["b2"].reshape(1, -1)
    b3 = params["b3"].reshape(1, -1)

    input_dim, h1 = w1.shape
    h2, out_dim = w2.shape[1], w3.shape[1]
    d_in_p = _round_up(input_dim, LANE)
    h1_p = _round_up(h1, LANE)
    h2_p = _round_up(h2, LANE)
    d_out_p = _round_up(out_dim, LANE)

    def pad2(a, rows, cols, dtype):
        a = a.astype(dtype)
        return jnp.pad(a, ((0, rows - a.shape[0]), (0, cols - a.shape[1])))

    arrays = dict(
        w1=pad2(w1, d_in_p, h1_p, jnp.bfloat16),
        b1=pad2(b1, 1, h1_p, jnp.float32),
        w2=pad2(w2, h1_p, h2_p, jnp.bfloat16),
        b2=pad2(b2, 1, h2_p, jnp.float32),
        w3=pad2(w3, h2_p, d_out_p, jnp.bfloat16),
        b3=pad2(b3, 1, d_out_p, jnp.float32),
    )
    return {"arrays": arrays, "out_dim": out_dim, "input_dim": input_dim}


@functools.partial(
    jax.jit,
    static_argnames=("tile_b", "b_p", "out_dim", "out_dtype", "vmem_limit",
                     "semantics", "single_buffer", "bf16_epilogue"))
def _forward_jit(x, w1, b1, w2, b2, w3, b3, *, tile_b, b_p, out_dim, out_dtype,
                 vmem_limit, semantics, single_buffer, bf16_epilogue):
    B, input_dim = x.shape
    d_in_p, h1_p = w1.shape
    h2_p = w2.shape[1]
    d_out_p = w3.shape[1]

    x_p = jnp.pad(x.astype(jnp.bfloat16),
                  ((0, b_p - B), (0, d_in_p - input_dim)))

    grid = (b_p // tile_b,)

    def const_spec(shape):
        idx = lambda i, _nd=len(shape): (0,) * _nd
        if single_buffer:
            # Constant index_map -> never re-fetched; 1 buffer halves weight VMEM.
            return pl.BlockSpec(shape, idx, pipeline_mode=pl.Buffered(1))
        return pl.BlockSpec(shape, idx)

    kernel = functools.partial(mlp_kernel, bf16_epilogue=bf16_epilogue)

    out_p = pl.pallas_call(
        kernel,
        out_shape=jax.ShapeDtypeStruct((b_p, d_out_p), out_dtype),
        grid_spec=pltpu.PrefetchScalarGridSpec(
            num_scalar_prefetch=0,
            grid=grid,
            in_specs=[
                pl.BlockSpec((tile_b, d_in_p), lambda i: (i, 0)),  # x tile
                const_spec((d_in_p, h1_p)),   # w1
                const_spec((1, h1_p)),        # b1
                const_spec((h1_p, h2_p)),     # w2
                const_spec((1, h2_p)),        # b2
                const_spec((h2_p, d_out_p)),  # w3
                const_spec((1, d_out_p)),     # b3
            ],
            out_specs=pl.BlockSpec((tile_b, d_out_p), lambda i: (i, 0)),
        ),
        compiler_params=pltpu.CompilerParams(
            dimension_semantics=semantics,
            vmem_limit_bytes=vmem_limit,
        ),
    )(x_p, w1, b1, w2, b2, w3, b3)

    return out_p[:B, :out_dim]


def mlp_embedding_forward(x, prepared, *, out_dtype=jnp.bfloat16, tile_b=None):
    """x: (B, input_dim) f32/bf16. prepared: output of prepare_params()."""
    B = x.shape[0]
    arrs = prepared["arrays"]
    d_in_p, h1_p = arrs["w1"].shape
    h2_p = arrs["w2"].shape[1]
    d_out_p = arrs["w3"].shape[1]
    out_bytes = jnp.dtype(out_dtype).itemsize

    flavor = _chip_flavor()
    base_tile, vmem_cap, bf16_epi = _FLAVOR_CFG[flavor]
    single_buffer = _buffered1_supported()

    def est(t):
        return _vmem_estimate(t, d_in_p, h1_p, h2_p, d_out_p, out_bytes, single_buffer)

    if tile_b is None:
        if B <= base_tile:
            # Single grid step: bf16-full (16,128) vregs, no per-step overhead,
            # and (on v7x) no duplicate weight DMA into both TensorCores.
            tile_b = max(16, _round_up(B, 16))
            semantics = ("arbitrary",)
        else:
            tile_b = base_tile
            # Shrink the batch tile if the working set would overflow the
            # per-chip VMEM budget (relevant on v7x's 64 MiB VMEM).
            while tile_b > 128 and est(tile_b) > vmem_cap:
                tile_b //= 2
            semantics = ("parallel",)
    else:
        tile_b = max(16, _round_up(tile_b, 16))
        semantics = ("parallel",) if B > tile_b else ("arbitrary",)

    b_p = _round_up(B, tile_b)
    vmem_limit = int(min(vmem_cap, max(32 * 1024 * 1024, 2 * est(tile_b))))

    # TODO(synk): if the VMEM-resident bf16 weights alone exceed `vmem_cap`
    # (possible on v7x for large hidden dims), fall back to K/N-tiled per-layer
    # matmuls (reduction grid axis + f32 accumulator) instead of this fused body.

    return _forward_jit(
        x, arrs["w1"], arrs["b1"], arrs["w2"], arrs["b2"], arrs["w3"], arrs["b3"],
        tile_b=tile_b, b_p=b_p, out_dim=prepared["out_dim"], out_dtype=out_dtype,
        vmem_limit=vmem_limit, semantics=semantics,
        single_buffer=single_buffer, bf16_epilogue=bf16_epi)


def init_params(key, input_dim, output_dim, num_hidden1, num_hidden2):
    """Deterministic parameter init (mimics nn.Linear uniform init)."""
    ks = jax.random.split(key, 6)

    def linear(kw, kb, fan_in, fan_out):
        bound = 1.0 / jnp.sqrt(fan_in)
        # stored as (in, out) so the kernel computes x @ W + b
        w = jax.random.uniform(kw, (fan_in, fan_out), jnp.float32, -bound, bound)
        b = jax.random.uniform(kb, (1, fan_out), jnp.float32, -bound, bound)
        return w, b

    w1, b1 = linear(ks[0], ks[1], input_dim, num_hidden1)
    w2, b2 = linear(ks[2], ks[3], num_hidden1, num_hidden2)
    w3, b3 = linear(ks[4], ks[5], num_hidden2, output_dim)
    return dict(w1=w1, b1=b1, w2=w2, b2=b2, w3=w3, b3=b3)


def mlp_reference(x, p):
    """Pure-JAX reference mirroring the kernel's bf16-input / f32-accumulate math."""
    lrelu = lambda v: jnp.where(v >= 0.0, v, LEAKY_SLOPE * v)
    bf = lambda a: a.astype(jnp.bfloat16).astype(jnp.float32)
    h = lrelu(bf(x) @ bf(p["w1"]) + p["b1"])
    h = lrelu(bf(h) @ bf(p["w2"]) + p["b2"])
    return bf(h) @ bf(p["w3"]) + p["b3"]


if __name__ == "__main__":
    # Small shapes consistent with the module's forward: x is (batch, input_dim).
    batch, input_dim, num_hidden1, num_hidden2, output_dim = 16, 32, 64, 48, 24

    key = jax.random.PRNGKey(0)
    kx, kp = jax.random.split(key)
    x = jax.random.normal(kx, (batch, input_dim), jnp.float32)
    params = init_params(kp, input_dim, output_dim, num_hidden1, num_hidden2)

    prepared = prepare_params(params)          # one-time weight pad/cast (hoisted)
    out = mlp_embedding_forward(x, prepared)   # bf16 output by default
    out = jax.block_until_ready(out)

    ref = mlp_reference(x, params)
    assert out.shape == (batch, output_dim)
    assert jnp.allclose(out.astype(jnp.float32), ref, atol=2e-2, rtol=2e-2), \
        "mismatch vs reference"

    print("KERNEL_OK")
</pallas_src>

<mosaic_0001>
module attributes {stable_mosaic.version = 11 : i64} {
  func.func @probe_kernel(%arg0: i32, %arg1: memref<16x128xf32, #tpu.memory_space<vmem>>, %arg2: memref<16x128xf32, #tpu.memory_space<vmem>>, %arg3: memref<16x128xf32, #tpu.memory_space<vmem>>) attributes {dimension_semantics = [#tpu.dimension_semantics<arbitrary>], iteration_bounds = array<i64: 2>, scalar_prefetch = 0 : i64, scratch_operands = 0 : i64, tpu.core_type = #tpu.core_type<tc>, window_params = [{transform_indices = @transform_0, window_bounds = array<i64: 16, 128>}, {pipeline_mode = #tpu.pipeline_mode<synchronous>, transform_indices = @transform_1, window_bounds = array<i64: 16, 128>}, {transform_indices = @transform_2, window_bounds = array<i64: 16, 128>}]} {
    %c0 = arith.constant 0 : index
    %c0_0 = arith.constant 0 : index
    %0 = vector.load %arg1[%c0, %c0_0] : memref<16x128xf32, #tpu.memory_space<vmem>>, vector<16x128xf32>
    %c0_1 = arith.constant 0 : index
    %c0_2 = arith.constant 0 : index
    %1 = vector.load %arg2[%c0_1, %c0_2] : memref<16x128xf32, #tpu.memory_space<vmem>>, vector<16x128xf32>
    %2 = arith.addf %0, %1 : vector<16x128xf32>
    %c0_3 = arith.constant 0 : index
    %c0_4 = arith.constant 0 : index
    %3 = vector.load %arg3[%c0_3, %c0_4] : memref<16x128xf32, #tpu.memory_space<vmem>>, vector<16x128xf32>
    tpu.vector_store %arg3[%c0_3, %c0_4], %2 {strides = array<i32>} : memref<16x128xf32, #tpu.memory_space<vmem>>, vector<16x128xf32>,
    return
  }
  func.func @transform_0(%arg0: i32) -> (i32, i32) {
    %c0_i32 = arith.constant 0 : i32
    %c0_i32_0 = arith.constant 0 : i32
    return %arg0, %c0_i32 : i32, i32
  }
  func.func @transform_1(%arg0: i32) -> (i32, i32) {
    %c0_i32 = arith.constant 0 : i32
    %c0_i32_0 = arith.constant 0 : i32
    %c0_i32_1 = arith.constant 0 : i32
    return %c0_i32, %c0_i32_0 : i32, i32
  }
  func.func @transform_2(%arg0: i32) -> (i32, i32) {
    %c0_i32 = arith.constant 0 : i32
    %c0_i32_0 = arith.constant 0 : i32
    return %arg0, %c0_i32 : i32, i32
  }
}

module attributes {stable_mosaic.version = 11 : i64} {
  func.func @mlp_kernel(%arg0: i32, %arg1: memref<16x128xbf16, #tpu.memory_space<vmem>>, %arg2: memref<128x128xbf16, #tpu.memory_space<vmem>>, %arg3: memref<1x128xf32, #tpu.memory_space<vmem>>, %arg4: memref<128x128xbf16, #tpu.memory_space<vmem>>, %arg5: memref<1x128xf32, #tpu.memory_space<vmem>>, %arg6: memref<128x128xbf16, #tpu.memory_space<vmem>>, %arg7: memref<1x128xf32, #tpu.memory_space<vmem>>, %arg8: memref<16x128xbf16, #tpu.memory_space<vmem>>) attributes {dimension_semantics = [#tpu.dimension_semantics<arbitrary>], iteration_bounds = array<i64: 1>, scalar_prefetch = 0 : i64, scratch_operands = 0 : i64, tpu.core_type = #tpu.core_type<tc>, window_params = [{transform_indices = @transform_0, window_bounds = array<i64: 16, 128>}, {pipeline_mode = #tpu.pipeline_mode<synchronous>, transform_indices = @transform_1, window_bounds = array<i64: 128, 128>}, {pipeline_mode = #tpu.pipeline_mode<synchronous>, transform_indices = @transform_2, window_bounds = array<i64: 1, 128>}, {pipeline_mode = #tpu.pipeline_mode<synchronous>, transform_indices = @transform_3, window_bounds = array<i64: 128, 128>}, {pipeline_mode = #tpu.pipeline_mode<synchronous>, transform_indices = @transform_4, window_bounds = array<i64: 1, 128>}, {pipeline_mode = #tpu.pipeline_mode<synchronous>, transform_indices = @transform_5, window_bounds = array<i64: 128, 128>}, {pipeline_mode = #tpu.pipeline_mode<synchronous>, transform_indices = @transform_6, window_bounds = array<i64: 1, 128>}, {transform_indices = @transform_7, window_bounds = array<i64: 16, 128>}]} {
    %c0 = arith.constant 0 : index
    %c0_0 = arith.constant 0 : index
    %0 = vector.load %arg1[%c0, %c0_0] : memref<16x128xbf16, #tpu.memory_space<vmem>>, vector<16x128xbf16>
    %c0_1 = arith.constant 0 : index
    %c0_2 = arith.constant 0 : index
    %1 = vector.load %arg2[%c0_1, %c0_2] : memref<128x128xbf16, #tpu.memory_space<vmem>>, vector<128x128xbf16>
    %cst = arith.constant dense<0.000000e+00> : vector<16x128xf32>
    %2 = tpu.matmul %0, %1, %cst {dimension_numbers = #tpu.dot_dimension_numbers<[1], [0], [0], [1], [0, 0, 1, 1], [], []>} : vector<16x128xbf16>, vector<128x128xbf16>, vector<16x128xf32> -> vector<16x128xf32>
    %c0_3 = arith.constant 0 : index
    %c0_4 = arith.constant 0 : index
    %3 = vector.load %arg3[%c0_3, %c0_4] : memref<1x128xf32, #tpu.memory_space<vmem>>, vector<1x128xf32>
    %4 = vector.broadcast %3 : vector<1x128xf32> to vector<16x128xf32>
    %5 = arith.addf %2, %4 : vector<16x128xf32>
    %cst_5 = arith.constant 0.000000e+00 : f32
    %6 = vector.broadcast %cst_5 : f32 to vector<16x128xf32>
    %7 = arith.cmpf oge, %5, %6 : vector<16x128xf32>
    %cst_6 = arith.constant 1.000000e-01 : f32
    %8 = vector.broadcast %cst_6 : f32 to vector<16x128xf32>
    %9 = arith.mulf %8, %5 : vector<16x128xf32>
    %10 = arith.select %7, %5, %9 : vector<16x128xi1>, vector<16x128xf32>
    %11 = arith.truncf %10 : vector<16x128xf32> to vector<16x128xbf16>
    %c0_7 = arith.constant 0 : index
    %c0_8 = arith.constant 0 : index
    %12 = vector.load %arg4[%c0_7, %c0_8] : memref<128x128xbf16, #tpu.memory_space<vmem>>, vector<128x128xbf16>
    %cst_9 = arith.constant dense<0.000000e+00> : vector<16x128xf32>
    %13 = tpu.matmul %11, %12, %cst_9 {dimension_numbers = #tpu.dot_dimension_numbers<[1], [0], [0], [1], [0, 0, 1, 1], [], []>} : vector<16x128xbf16>, vector<128x128xbf16>, vector<16x128xf32> -> vector<16x128xf32>
    %c0_10 = arith.constant 0 : index
    %c0_11 = arith.constant 0 : index
    %14 = vector.load %arg5[%c0_10, %c0_11] : memref<1x128xf32, #tpu.memory_space<vmem>>, vector<1x128xf32>
    %15 = vector.broadcast %14 : vector<1x128xf32> to vector<16x128xf32>
    %16 = arith.addf %13, %15 : vector<16x128xf32>
    %cst_12 = arith.constant 0.000000e+00 : f32
    %17 = vector.broadcast %cst_12 : f32 to vector<16x128xf32>
    %18 = arith.cmpf oge, %16, %17 : vector<16x128xf32>
    %cst_13 = arith.constant 1.000000e-01 : f32
    %19 = vector.broadcast %cst_13 : f32 to vector<16x128xf32>
    %20 = arith.mulf %19, %16 : vector<16x128xf32>
    %21 = arith.select %18, %16, %20 : vector<16x128xi1>, vector<16x128xf32>
    %22 = arith.truncf %21 : vector<16x128xf32> to vector<16x128xbf16>
    %c0_14 = arith.constant 0 : index
    %c0_15 = arith.constant 0 : index
    %23 = vector.load %arg6[%c0_14, %c0_15] : memref<128x128xbf16, #tpu.memory_space<vmem>>, vector<128x128xbf16>
    %cst_16 = arith.constant dense<0.000000e+00> : vector<16x128xf32>
    %24 = tpu.matmul %22, %23, %cst_16 {dimension_numbers = #tpu.dot_dimension_numbers<[1], [0], [0], [1], [0, 0, 1, 1], [], []>} : vector<16x128xbf16>, vector<128x128xbf16>, vector<16x128xf32> -> vector<16x128xf32>
    %c0_17 = arith.constant 0 : index
    %c0_18 = arith.constant 0 : index
    %25 = vector.load %arg7[%c0_17, %c0_18] : memref<1x128xf32, #tpu.memory_space<vmem>>, vector<1x128xf32>
    %26 = vector.broadcast %25 : vector<1x128xf32> to vector<16x128xf32>
    %27 = arith.addf %24, %26 : vector<16x128xf32>
    %28 = arith.truncf %27 : vector<16x128xf32> to vector<16x128xbf16>
    %c0_19 = arith.constant 0 : index
    %c0_20 = arith.constant 0 : index
    %29 = vector.load %arg8[%c0_19, %c0_20] : memref<16x128xbf16, #tpu.memory_space<vmem>>, vector<16x128xbf16>
    tpu.vector_store %arg8[%c0_19, %c0_20], %28 {strides = array<i32>} : memref<16x128xbf16, #tpu.memory_space<vmem>>, vector<16x128xbf16>,
    return
  }
  func.func @transform_0(%arg0: i32) -> (i32, i32) {
    %c0_i32 = arith.constant 0 : i32
    %c0_i32_0 = arith.constant 0 : i32
    return %arg0, %c0_i32 : i32, i32
  }
  func.func @transform_1(%arg0: i32) -> (i32, i32) {
    %c0_i32 = arith.constant 0 : i32
    %c0_i32_0 = arith.constant 0 : i32
    %c0_i32_1 = arith.constant 0 : i32
    return %c0_i32, %c0_i32_0 : i32, i32
  }
  func.func @transform_2(%arg0: i32) -> (i32, i32) {
    %c0_i32 = arith.constant 0 : i32
    %c0_i32_0 = arith.constant 0 : i32
    %c0_i32_1 = arith.constant 0 : i32
    return %c0_i32, %c0_i32_0 : i32, i32
  }
  func.func @transform_3(%arg0: i32) -> (i32, i32) {
    %c0_i32 = arith.constant 0 : i32
    %c0_i32_0 = arith.constant 0 : i32
    %c0_i32_1 = arith.constant 0 : i32
    return %c0_i32, %c0_i32_0 : i32, i32
  }
  func.func @transform_4(%arg0: i32) -> (i32, i32) {
    %c0_i32 = arith.constant 0 : i32
    %c0_i32_0 = arith.constant 0 : i32
    %c0_i32_1 = arith.constant 0 : i32
    return %c0_i32, %c0_i32_0 : i32, i32
  }
  func.func @transform_5(%arg0: i32) -> (i32, i32) {
    %c0_i32 = arith.constant 0 : i32
    %c0_i32_0 = arith.constant 0 : i32
    %c0_i32_1 = arith.constant 0 : i32
    return %c0_i32, %c0_i32_0 : i32, i32
  }
  func.func @transform_6(%arg0: i32) -> (i32, i32) {
    %c0_i32 = arith.constant 0 : i32
    %c0_i32_0 = arith.constant 0 : i32
    %c0_i32_1 = arith.constant 0 : i32
    return %c0_i32, %c0_i32_0 : i32, i32
  }
  func.func @transform_7(%arg0: i32) -> (i32, i32) {
    %c0_i32 = arith.constant 0 : i32
    %c0_i32_0 = arith.constant 0 : i32
    return %arg0, %c0_i32 : i32, i32
  }
}

</mosaic_0001>

<bundles_post_ra>
// kernel: tpu_custom_call.1
= control target key start
LH: loop header
LB: loop body
LE: loop exit
PB: predicated region body
PF: predicated region fallthrough
CT: control target
= control target key end

     0   :  { %7 = vsyncpa [#allocation3], 0  ;;  %s692_s0 = inlined_call_operand.hbm [shape: f32[32,128], index: 0, kind: input, shape index: {}]   ;;  %s693_s1 = inlined_call_operand.hbm [shape: f32[16,128], index: 1, kind: input, shape index: {}]   ;;  %s694_s2 = inlined_call_operand.hbm [shape: f32[32,128], index: 2, kind: output, shape index: {}]  }
   0x1   :  { %9 = vsyncpa [#allocation3 + $0x1], 0 }
   0x2   :  { %10 = vsyncpa [#allocation6], 0 }
   0x3   :  { %11 = vsyncpa [#allocation4], 0 }
   0x4   :  { %13 = vsyncpa [#allocation4 + $0x1], 0  ;;  %s509_s9 = smov 0   ;;  %s511_s10 = smov 0  }
   0x5   :  { %s513_s11 = smov 0   ;;  %s515_s12 = smov 0  }
   0x6 LB: > { %s530_s13 = sadd.s32 4294967295, %s485_s12   ;;  %s284_s14 = sadd.s32 4294967294, %s485_s12   ;;  %s485_s12 = sphi %s515_s12, %s716_s12   ;;  %s481_s11 = sphi %s513_s11, %s715_s11   ;;  %s477_s10 = sphi %s511_s10, %s714_s10   ;;  %s473_s9 = sphi %s509_s9, %s713_s9  }
   0x7   : > { %p39_p0 = scmp.ne.s32.totalorder %s477_s10, %s473_s9  ;;  %p695_p1 = scmp.eq.s32.totalorder %s530_s13, 0 }
   0x8   : > { %p90_p3 = scmp.eq.s32.totalorder %s284_s14, 1  ;;  %p285_p5 = scmp.ge.s32.totalorder %s485_s12, 1 }
   0x9   : > { %p539_p4 = por %p695_p1, %p39_p0  ;;  %p97_p7 = scmp.lt.s32.totalorder %s485_s12, 3 }
   0xa   : > { %p544_p6 = por %p90_p3, %p39_p0  ;;  %s487_s18 = smov [#allocation5]  }
   0xb   : > { %s699_s15 = scalar_select %p539_p4, 1, 0 }
   0xc   : > { %s700_s16 = scalar_select %p544_p6, 1, 0 }
   0xd   : > { %p549_p8 = pnand %p285_p5, %p97_p7  ;;  %s109_s19 = sshll.u32 %s487_s18, 4  ;;  %s110_s19 = int_to_ptr.vmem [resolvable:$true] %s109_s19 }
   0xe   : > { %s563_s21 = sadd.s32 1, %s485_s12   ;;  %s26_s22 = sadd.s32 1, %s481_s11 }
   0xf   : > { %s701_s17 = scalar_select %p549_p8, 1, 0 }
  0x10   : > { %p310_p9 = pneg %p549_p8  ;;  %s23_s23 = ssub.s32 %s485_s12, %s563_s21 }
  0x11   : > { %s374_s24 = scalar_lea.vmem %s110_s19, 256  ;;  %p382_p5 = scmp.lt.s32.totalorder %s110_s19, %s110_s19 }
  0x12   : > { %p558_p11 = pnand %p310_p9, %p695_p1  ;;  %p375_p13 = scmp.ne.s32.totalorder %s110_s19, %s374_s24 }
  0x13   : > { %p383_p7 = scmp.lt.s32.totalorder %s374_s24, %s374_s24 }
  0x14   : > { %p365_p12 = pneg %p558_p11 }
  0x15   : > { %p384_p10 = por %p383_p7, %p382_p5 }
  0x16   : > { %p377_p0 = pnand %p375_p13, %p365_p12 }
  0x18   : > { %p378_p3 = pneg %p377_p0 }
  0x1a   : > { %p385_p2 = pnand %p384_p10, %p378_p3 }
  0x1c   : > { %388 = shalt.err (!%p385_p2)
}
  0x1d   : > { %s488_s25 = smov 128   ;;  %s489_s26 = smov 8  }
  0x1e   : > { %313 = dma.hbm_to_vmem [thread:$0]  (!%p558_p11), %s693_s1, 256, %s110_s19, [#allocation6], %s488_s25, %s488_s25, %s489_s26  }
  0x1f   : > { %p24_p2 = scmp.eq.s32.totalorder %s23_s23, 0  ;;  %p33_p9 = scmp.ne.s32.totalorder %s481_s11, %s477_s10 }
  0x20   : > { %p34_p10 = scmp.eq.s32.totalorder %s485_s12, 0  ;;  %p323_p12 = scmp.lt.s32.totalorder %s485_s12, 2 }
  0x21   : > { %s583_s29 = scalar_select %p24_p2, %s481_s11, %s26_s22  }
  0x22   : > { %p35_p13 = por %p34_p10, %p33_p9  ;;  %p703_p0 = scmp.eq.s32.totalorder %s530_s13, 1 }
  0x23   : > { %s123_s3 = sand.u32 1, %s481_s11   ;;  %s300_s4 = sshll.u32 %s485_s12, 8 }
  0x24   : > { %p587_p3 = por %p703_p0, %p33_p9  ;;  %s288_s5 = sshll.u32 %s123_s3, 4 }
  0x25   : > { %s596_s8 = scalar_lea.hbm %s692_s0, %s300_s4  ;;  %s127_s14 = scalar_lea.vmem [#allocation2], %s288_s5 }
  0x26   : > { %s704_s30 = scalar_select %p587_p3, 1, 0 }
  0x27   : > { %s134_s18 = sshll.u32 %s127_s14, 4  ;;  %p598_p11 = pnand %p323_p12, %p35_p13  ;;  %s602_s18 = int_to_ptr.vmem [resolvable:$true] %s134_s18 }
  0x28   : > { %s604_s20 = scalar_lea.sflag [#allocation3], %s123_s3  ;;  %s389_s22 = scalar_lea.hbm %s596_s8, 256 }
  0x29   : > { %p390_p5 = scmp.ne.s32.totalorder %s596_s8, %s389_s22  ;;  %p391_p7 = pneg %p598_p11 }
  0x2a   : > { %s394_s27 = scalar_lea.hbm %s692_s0, 512  ;;  %p395_p10 = scmp.lt.s32.totalorder %s596_s8, %s692_s0 }
  0x2b   : > { %p392_p2 = pnand %p391_p7, %p390_p5  ;;  %p396_p12 = scmp.lt.s32.totalorder %s394_s27, %s389_s22 }
  0x2d   : > { %p393_p9 = pneg %p392_p2  ;;  %p397_p13 = por %p396_p12, %p395_p10 }
  0x2f   : > { %p398_p0 = pnand %p397_p13, %p393_p9 }
  0x31   : > { %401 = shalt.err (!%p398_p0)
}
  0x32   : > { %s402_s3 = scalar_lea.vmem %s602_s18, 256  ;;  %s490_s5 = smov [#allocation2]  }
  0x33   : > { %p403_p1 = scmp.ne.s32.totalorder %s602_s18, %s402_s3  ;;  %s407_s6 = sshll.u32 %s490_s5, 4  ;;  %s408_s6 = int_to_ptr.vmem [resolvable:$false] %s407_s6 }
  0x34   : > { %s409_s7 = scalar_lea.vmem %s408_s6, 512  ;;  %p410_p2 = scmp.lt.s32.totalorder %s602_s18, %s408_s6 }
  0x35   : > { %p405_p6 = pnand %p403_p1, %p391_p7  ;;  %p411_p3 = scmp.lt.s32.totalorder %s409_s7, %s402_s3 }
  0x37   : > { %p406_p5 = pneg %p405_p6  ;;  %p412_p4 = por %p411_p3, %p410_p2 }
  0x39   : > { %p413_p8 = pnand %p412_p4, %p406_p5 }
  0x3b   : > { %416 = shalt.err (!%p413_p8)
}
  0x3c   : > { %317 = dma.hbm_to_vmem [thread:$0]  (!%p598_p11), %s596_s8, 256, %s602_s18, %s604_s20, %s488_s25, %s488_s25, %s489_s26  }
  0x3d   : > { %p706_p1 = scmp.ne.s32.totalorder %s701_s17, 0 }
  0x3e   : > { %s631_s14 = sand.u32 (!%p706_p1), 1, %s477_s10   ;;  %p707_p4 = scmp.ne.s32.totalorder (!%p706_p1), %s699_s15, 0 }
  0x3f   : > { %146 = sbr.rel (%p706_p1) target bundleno = 98 (0x62), region = 28  ;;  %s292_s22 = sshll.u32 (!%p706_p1), %s631_s14, 4 }
  0x40   : > { %s149_s23 = scalar_lea.sflag (!%p706_p1), [#allocation3], %s631_s14  ;;  %s152_s24 = scalar_lea.vmem (!%p706_p1), [#allocation2], %s292_s22 }
  0x44   : > { %460 = dma.done.wait (%p707_p4), %s149_s23, 256  }
  0x45   : > { %462 = vsyncadd (%p707_p4), %s149_s23, 4294967040  ;;  %p708_p6 = scmp.eq.s32.totalorder %s530_s13, 0 }
  0x47   : > { %464 = dma.done.wait (%p708_p6), [#allocation6], 256   ;;  %p709_p8 = pmov %p708_p6 }
  0x48   : > { %s176_s17 = scalar_lea.vmem [#allocation7], %s292_s22  ;;  %s301_s26 = sshll.u32 %s530_s13, 8  ;;  %v179_v0 = vld [vmem:[%s152_s24] sm:$0xff]  ;;  %v180_v2 = vld [vmem:[%s152_s24 + $0x8] sm:$0xff] }
  0x49   : > { %466 = vsyncadd (%p709_p8), [#allocation6], 4294967040  ;;  %s201_s25 = sshll.u32 %s176_s17, 4  ;;  %v181_v1 = vld [vmem:[#allocation5] sm:$0xff]  ;;  %v182_v4 = vld [vmem:[#allocation5 + $0x8] sm:$0xff]  ;;  %s649_s18 = scalar_lea.hbm %s694_s2, %s301_s26  ;;  %s644_s25 = int_to_ptr.vmem [resolvable:$true] %s201_s25 }
  0x4a   : > { %v183_v3 = vadd.f32 %v181_v1, %v179_v0  ;;  %v184_v5 = vadd.f32 %v182_v4, %v180_v2  ;;  %s188_s19 = scalar_lea.sflag [#allocation4], %s631_s14  ;;  %s417_s13 = scalar_lea.vmem %s644_s25, 256 }
  0x4b   : > { %p418_p3 = scmp.ne.s32.totalorder %s644_s25, %s417_s13  ;;  %p710_p11 = scmp.ne.s32.totalorder %s704_s30, 0 }
  0x4c   : > { %185 = vst [vmem:[%s176_s17] sm:$0xff] %v183_v3  ;;  %186 = vst [vmem:[%s176_s17 + $0x8] sm:$0xff] %v184_v5  ;;  %s491_s20 = smov [#allocation7]  }
  0x4d   : > { %p419_p7 = pnand %p418_p3, %p710_p11  ;;  %s421_s27 = sshll.u32 %s491_s20, 4  ;;  %s422_s27 = int_to_ptr.vmem [resolvable:$false] %s421_s27 }
  0x4e   : > { %s423_s28 = scalar_lea.vmem %s422_s27, 512  ;;  %p424_p10 = scmp.lt.s32.totalorder %s644_s25, %s422_s27 }
  0x4f   : > { %p420_p9 = pneg %p419_p7  ;;  %p425_p12 = scmp.lt.s32.totalorder %s423_s28, %s417_s13 }
  0x51   : > { %p426_p13 = por %p425_p12, %p424_p10 }
  0x53   : > { %p427_p0 = pnand %p426_p13, %p420_p9 }
  0x55   : > { %430 = shalt.err (!%p427_p0)
}
  0x56   : > { %s431_s4 = scalar_lea.hbm %s649_s18, 256  ;;  %s435_s6 = scalar_lea.hbm %s694_s2, 512 }
  0x57   : > { %p432_p5 = scmp.ne.s32.totalorder %s649_s18, %s431_s4  ;;  %p436_p4 = scmp.lt.s32.totalorder %s649_s18, %s694_s2 }
  0x58   : > { %p437_p6 = scmp.lt.s32.totalorder %s435_s6, %s431_s4 }
  0x59   : > { %p433_p2 = pnand %p432_p5, %p710_p11 }
  0x5a   : > { %p438_p8 = por %p437_p6, %p436_p4 }
  0x5b   : > { %p434_p1 = pneg %p433_p2 }
  0x5d   : > { %p439_p3 = pnand %p438_p8, %p434_p1 }
  0x5f   : > { %442 = shalt.err (!%p439_p3)
}
  0x60   : > { %s492_s23 = smov 128   ;;  %s493_s24 = smov 8  }
  0x61   : > { %308 = dma.vmem_to_hbm [thread:$0]  (%p710_p11), %s644_s25, 256, %s649_s18, %s188_s19, %s492_s23, %s492_s23, %s493_s24  }
  0x62 PF: > { %s216_s17 = sand.u32 1, %s473_s9   ;;  %p711_p7 = scmp.ne.s32.totalorder %s700_s16, 0 }
  0x63   : > { %p712_p9 = scmp.ge.s32.totalorder %s485_s12, 2  ;;  %s217_s26 = scalar_lea.sflag [#allocation4], %s216_s17 }
  0x65   : > { %p319_p10 = pnand %p712_p9, %p711_p7 }
  0x67   : > { %p320_p12 = pneg %p319_p10 }
  0x69   : > { %468 = dma.done.wait (%p320_p12), %s217_s26, 256  }
  0x6a   : > { %470 = vsyncadd (%p320_p12), %s217_s26, 4294967040  ;;  %p16_p13 = scmp.ge.s32.totalorder %s563_s21, 4   ;;  %s713_s9 = smov %s477_s10 }
  0x6b   : > { %s714_s10 = smov %s481_s11  ;;  %s715_s11 = smov %s583_s29 }
  0x6c   : > { %s716_s12 = smov %s563_s21  ;;  %18 = sbr.rel (!%p16_p13) target bundleno = 6 (0x6), region = 77 }
  0x71   :  { %222 = vsyncpa [#allocation3], 1 }
  0x72   :  { %224 = vsyncpa [#allocation3 + $0x1], 1 }
  0x73   :  { %225 = vsyncpa [#allocation6], 1 }
  0x74   :  { %226 = vsyncpa [#allocation4], 1 }
  0x75   :  { %228 = vsyncpa [#allocation4 + $0x1], 1 }

// kernel: _forward_jit.1
= control target key start
LH: loop header
LB: loop body
LE: loop exit
PB: predicated region body
PF: predicated region fallthrough
CT: control target
= control target key end

     0   :  { %12 = vsyncpa [#allocation3], 0  ;;  %s812_s0 = inlined_call_operand.vmem [shape: bf16[16,128], index: 0, kind: input, shape index: {}]   ;;  %s813_s1 = inlined_call_operand.hbm [shape: bf16[128,128], index: 1, kind: input, shape index: {}]   ;;  %s814_s2 = inlined_call_operand.vmem [shape: f32[1,128], index: 2, kind: input, shape index: {}]   ;;  %s815_s3 = inlined_call_operand.hbm [shape: bf16[128,128], index: 3, kind: input, shape index: {}]   ;;  %s816_s4 = inlined_call_operand.vmem [shape: f32[1,128], index: 4, kind: input, shape index: {}]   ;;  %s817_s5 = inlined_call_operand.hbm [shape: bf16[128,128], index: 5, kind: input, shape index: {}]   ;;  %s818_s6 = inlined_call_operand.vmem [shape: f32[1,128], index: 6, kind: input, shape index: {}]   ;;  %s819_s7 = inlined_call_operand.hbm [shape: bf16[16,128], index: 7, kind: output, shape index: {}]  }
   0x1   :  { %13 = vsyncpa [#allocation6], 0 }
   0x2   :  { %14 = vsyncpa [#allocation4], 0  ;;  %s698_s24 = smov [#allocation5]   ;;  %s699_s26 = smov [#allocation2]  }
   0x3   :  { %s36_s25 = sshll.u32 %s698_s24, 4  ;;  %s22_s27 = sshll.u32 %s699_s26, 4  ;;  %s37_s25 = int_to_ptr.vmem [resolvable:$true] %s36_s25  ;;  %s23_s27 = int_to_ptr.vmem [resolvable:$true] %s22_s27 }
   0x4   :  { %s620_s28 = scalar_lea.vmem %s37_s25, 1024  ;;  %p625_p1 = scmp.lt.s32.totalorder %s37_s25, %s37_s25 }
   0x5   :  { %p621_p0 = scmp.ne.s32.totalorder %s37_s25, %s620_s28  ;;  %p626_p2 = scmp.lt.s32.totalorder %s620_s28, %s620_s28 }
   0x7   :  { %p627_p3 = por %p626_p2, %p625_p1 }
   0x9   :  { %p628_p4 = pnand %p627_p3, %p621_p0 }
   0xb   :  { %631 = shalt.err (!%p628_p4)
}
   0xc   :  { %s700_s29 = smov 64   ;;  %s701_s30 = smov 4  }
   0xd   :  { %42 = dma.hbm_to_vmem [thread:$0]  %s815_s3, 1024, %s37_s25, [#allocation6], %s700_s29, %s700_s29, %s701_s30  }
   0xe   :  { %s640_s10 = scalar_lea.vmem %s23_s27, 1024  ;;  %p645_p6 = scmp.lt.s32.totalorder %s23_s27, %s23_s27 }
   0xf   :  { %p641_p5 = scmp.ne.s32.totalorder %s23_s27, %s640_s10  ;;  %p646_p7 = scmp.lt.s32.totalorder %s640_s10, %s640_s10 }
  0x11   :  { %p647_p8 = por %p646_p7, %p645_p6 }
  0x13   :  { %p648_p9 = pnand %p647_p8, %p641_p5 }
  0x15   :  { %651 = shalt.err (!%p648_p9)
}
  0x16   :  { %28 = dma.hbm_to_vmem [thread:$0]  %s813_s1, 1024, %s23_s27, [#allocation3], %s700_s29, %s700_s29, %s701_s30  }
  0x17   :  { %s702_s13 = smov [#allocation7]  }
  0x18   :  { %s50_s14 = sshll.u32 %s702_s13, 4  ;;  %s51_s14 = int_to_ptr.vmem [resolvable:$true] %s50_s14 }
  0x19   :  { %s660_s15 = scalar_lea.vmem %s51_s14, 1024  ;;  %p665_p11 = scmp.lt.s32.totalorder %s51_s14, %s51_s14 }
  0x1a   :  { %p661_p10 = scmp.ne.s32.totalorder %s51_s14, %s660_s15  ;;  %p666_p12 = scmp.lt.s32.totalorder %s660_s15, %s660_s15 }
  0x1c   :  { %p667_p13 = por %p666_p12, %p665_p11 }
  0x1e   :  { %p668_p0 = pnand %p667_p13, %p661_p10 }
  0x20   :  { %671 = shalt.err (!%p668_p0)
}
  0x21   :  { %56 = dma.hbm_to_vmem [thread:$0]  %s817_s5, 1024, %s51_s14, [#allocation6], %s700_s29, %s700_s29, %s701_s30  }
  0x22   :  { %692 = dma.done.wait [#allocation3], 1024  }
  0x23   :  { %693 = vsyncadd [#allocation3], 4294966272 }
  0x24   :  { %694 = dma.done.wait [#allocation6], 2048  }
  0x25   :  { %695 = vsyncadd [#allocation6], 4294965248  ;;  %v703_v0 = vmov 0.0   ;;  %vm704_vm0 = vmmov 0   ;;  %v587_v1 = vld [vmem:[#allocation2 + $0x38] sm:$0xff]   ;;  %v588_v2 = vld [vmem:[#allocation2 + $0x30] sm:$0xff]  }
  0x26   :  { %519 = vmatprep.subr.bf16.mxu0 %v703_v0  ;;  %535 = vmatprep.mubr.msk.bf16.mxu0 %vm704_vm0, %v703_v0  ;;  %v589_v3 = vld [vmem:[#allocation2 + $0x28] sm:$0xff]   ;;  %v596_v4 = vld [vmem:[#allocation5 + $0x38] sm:$0xff]   ;;  %v590_v5 = vld [vmem:[#allocation2 + $0x20] sm:$0xff]  }
  0x27   :  { %539 = vmatprep.subr.bf16.mxu1 %v703_v0  ;;  %555 = vmatprep.mubr.msk.bf16.mxu1 %vm704_vm0, %v703_v0  ;;  %v597_v6 = vld [vmem:[#allocation5 + $0x30] sm:$0xff]   ;;  %v591_v7 = vld [vmem:[#allocation2 + $0x18] sm:$0xff]   ;;  %v598_v8 = vld [vmem:[#allocation5 + $0x28] sm:$0xff]  }
  0x28   :  { %520 = vmatpush3.bf16.msra.mxu0 %v587_v1  ;;  %540 = vmatpush3.bf16.msra.mxu1 %v596_v4  ;;  %v592_v9 = vld [vmem:[#allocation2 + $0x10] sm:$0xff]   ;;  %v599_v10 = vld [vmem:[#allocation5 + $0x20] sm:$0xff]   ;;  %v593_v11 = vld [vmem:[#allocation2 + $0x8] sm:$0xff]  }
  0x29   :  { %521 = vmatprep.subr.bf16.mxu0 %v703_v0  ;;  %541 = vmatprep.subr.bf16.mxu1 %v703_v0  ;;  %v600_v12 = vld [vmem:[#allocation5 + $0x18] sm:$0xff]   ;;  %v594_v13 = vld [vmem:[#allocation2] sm:$0xff]   ;;  %v601_v15 = vld [vmem:[#allocation5 + $0x10] sm:$0xff]  }
  0x2a   :  { %v595_v14 = vld [vmem:[%s812_s0] sm:$0xff]   ;;  %v602_v16 = vld [vmem:[#allocation5 + $0x8] sm:$0xff]   ;;  %v604_v18 = vld [vmem:[#allocation7 + $0x38] sm:$0xff]  }
  0x2b   :  { %v603_v17 = vld [vmem:[#allocation5] sm:$0xff]   ;;  %v605_v19 = vld [vmem:[#allocation7 + $0x30] sm:$0xff]   ;;  %v606_v20 = vld [vmem:[#allocation7 + $0x28] sm:$0xff]  }
  0x2c   :  { %522 = vmatpush3.bf16.msra.mxu0 %v588_v2  ;;  %542 = vmatpush3.bf16.msra.mxu1 %v597_v6  ;;  %v607_v21 = vld [vmem:[#allocation7 + $0x20] sm:$0xff]   ;;  %v608_v22 = vld [vmem:[#allocation7 + $0x18] sm:$0xff]   ;;  %v609_v35 = vld [vmem:[#allocation7 + $0x10] sm:$0xff]  }
  0x2d   :  { %523 = vmatprep.subr.bf16.mxu0 %v703_v0  ;;  %543 = vmatprep.subr.bf16.mxu1 %v703_v0  ;;  %v455_v23 = vld [vmem:[%s814_s2] ss:$0 sm:$0xff]  ;;  %v610_v36 = vld [vmem:[#allocation7 + $0x8] sm:$0xff]  }
  0x2e   :  { %v611_v37 = vld [vmem:[#allocation7] sm:$0xff]  }
  0x2f   :  { %v465_v38 = vld [vmem:[%s816_s4] ss:$0 sm:$0xff]  ;;  %s705_s4 = smov [#allocation8]  }
  0x30   :  { %524 = vmatpush3.bf16.msra.mxu0 %v589_v3  ;;  %544 = vmatpush3.bf16.msra.mxu1 %v598_v8  ;;  %v474_v51 = vld [vmem:[%s818_s6] ss:$0 sm:$0xff]  ;;  %s442_s21 = sshll.u32 %s705_s4, 4  ;;  %s443_s21 = int_to_ptr.vmem [resolvable:$true] %s442_s21 }
  0x31   :  { %525 = vmatprep.subr.bf16.mxu0 %v703_v0  ;;  %545 = vmatprep.subr.bf16.mxu1 %v703_v0  ;;  %s672_s22 = scalar_lea.vmem %s443_s21, 128  ;;  %p677_p2 = scmp.lt.s32.totalorder %s443_s21, %s443_s21 }
  0x32   :  { %p673_p1 = scmp.ne.s32.totalorder %s443_s21, %s672_s22  ;;  %p678_p3 = scmp.lt.s32.totalorder %s672_s22, %s672_s22 }
  0x34   :  { %526 = vmatpush3.bf16.msra.mxu0 %v590_v5  ;;  %546 = vmatpush3.bf16.msra.mxu1 %v599_v10  ;;  %p679_p4 = por %p678_p3, %p677_p2 }
  0x35   :  { %527 = vmatprep.subr.bf16.mxu0 %v703_v0  ;;  %547 = vmatprep.subr.bf16.mxu1 %v703_v0 }
  0x36   :  { %p680_p5 = pnand %p679_p4, %p673_p1 }
  0x38   :  { %528 = vmatpush3.bf16.msra.mxu0 %v591_v7  ;;  %548 = vmatpush3.bf16.msra.mxu1 %v600_v12 }
  0x39   :  { %529 = vmatprep.subr.bf16.mxu0 %v703_v0  ;;  %549 = vmatprep.subr.bf16.mxu1 %v703_v0 }
  0x3c   :  { %530 = vmatpush3.bf16.msra.mxu0 %v592_v9  ;;  %550 = vmatpush3.bf16.msra.mxu1 %v601_v15 }
  0x3d   :  { %531 = vmatprep.subr.bf16.mxu0 %v703_v0  ;;  %551 = vmatprep.subr.bf16.mxu1 %v703_v0 }
  0x40   :  { %532 = vmatpush3.bf16.msra.mxu0 %v593_v11  ;;  %552 = vmatpush3.bf16.msra.mxu1 %v602_v16 }
  0x41   :  { %533 = vmatprep.subr.bf16.mxu0 %v703_v0  ;;  %553 = vmatprep.subr.bf16.mxu1 %v703_v0 }
  0x44   :  { %534 = vmatpush3.bf16.msra.mxu0 %v594_v13  ;;  %554 = vmatpush3.bf16.msra.mxu1 %v603_v17 }
  0x45   :  { %559 = vmatprep.subr.bf16.mxu0 %v703_v0 }
  0x47   :  { %536 = vmatmul.mubr.bf16.vlgmr.msra.gmra.mxu0 %v595_v14 }
  0x48   :  { %575 = vmatprep.mubr.msk.bf16.mxu0 %vm704_vm0, %v703_v0  ;;  %560 = vmatpush3.bf16.msra.mxu0 %v604_v18 }
  0x49   :  { %561 = vmatprep.subr.bf16.mxu0 %v703_v0 }
  0x4c   :  { %562 = vmatpush3.bf16.msra.mxu0 %v605_v19 }
  0x4d   :  { %563 = vmatprep.subr.bf16.mxu0 %v703_v0 }
  0x50   :  { %564 = vmatpush3.bf16.msra.mxu0 %v606_v20 }
  0x51   :  { %565 = vmatprep.subr.bf16.mxu0 %v703_v0 }
  0x54   :  { %566 = vmatpush3.bf16.msra.mxu0 %v607_v21 }
  0x55   :  { %567 = vmatprep.subr.bf16.mxu0 %v703_v0 }
  0x58   :  { %568 = vmatpush3.bf16.msra.mxu0 %v608_v22 }
  0x59   :  { %569 = vmatprep.subr.bf16.mxu0 %v703_v0 }
  0x5c   :  { %570 = vmatpush3.bf16.msra.mxu0 %v609_v35 }
  0x5d   :  { %571 = vmatprep.subr.bf16.mxu0 %v703_v0 }
  0x60   :  { %572 = vmatpush3.bf16.msra.mxu0 %v610_v36 }
  0x61   :  { %573 = vmatprep.subr.bf16.mxu0 %v703_v0 }
  0x64   :  { %574 = vmatpush3.bf16.msra.mxu0 %v611_v37 }
 0x107   :  { %v182_v24 = vpop.f32.mrf.mxu0 }
 0x108   :  { %v183_v25 = vadd.f32 %v455_v23, %v182_v24 }
 0x109   :  { %v537_v26 = vpop.f32.mrf.mxu0 }
 0x10a   :  { %v191_v28 = vmul.f32 0.1, %v183_v25  ;;  %vm189_vm1 = vcmp.ge.f32.partialorder %v183_v25, 0.0 }
 0x10b   :  { %v185_v27 = vpop.f32.mrf.mxu0 }
 0x10c   :  { %v186_v29 = vadd.f32 %v455_v23, %v185_v27  ;;  %v193_v32 = vsel %vm189_vm1, %v183_v25, %v191_v28 }
 0x10d   :  { %v538_v30 = vpop.f32.mrf.mxu0 }
 0x10e   :  { %vm190_vm2 = vcmp.ge.f32.partialorder %v186_v29, 0.0  ;;  %v192_v31 = vmul.f32 0.1, %v186_v29 }
 0x110   :  { %v194_v33 = vsel %vm190_vm2, %v186_v29, %v192_v31 }
 0x111   :  { %v195_v34 = vpack.c.bf16 %v194_v33, %v193_v32 }
 0x113   :  { %556 = vmatmul.mubr.bf16.vlgmr.msra.gmra.mxu1 %v195_v34 }
 0x1d3   :  { %v301_v39 = vpop.f32.mrf.mxu1 }
 0x1d4   :  { %v302_v40 = vadd.f32 %v465_v38, %v301_v39 }
 0x1d5   :  { %v557_v41 = vpop.f32.mrf.mxu1 }
 0x1d6   :  { %v310_v43 = vmul.f32 0.1, %v302_v40  ;;  %vm308_vm3 = vcmp.ge.f32.partialorder %v302_v40, 0.0 }
 0x1d7   :  { %v304_v42 = vpop.f32.mrf.mxu1 }
 0x1d8   :  { %v305_v44 = vadd.f32 %v465_v38, %v304_v42  ;;  %v312_v47 = vsel %vm308_vm3, %v302_v40, %v310_v43 }
 0x1d9   :  { %v558_v45 = vpop.f32.mrf.mxu1 }
 0x1da   :  { %vm309_vm4 = vcmp.ge.f32.partialorder %v305_v44, 0.0  ;;  %v311_v46 = vmul.f32 0.1, %v305_v44 }
 0x1dc   :  { %v313_v48 = vsel %vm309_vm4, %v305_v44, %v311_v46 }
 0x1dd   :  { %v314_v49 = vpack.c.bf16 %v313_v48, %v312_v47 }
 0x1df   :  { %576 = vmatmul.mubr.bf16.vlgmr.msra.gmra.mxu0 %v314_v49 }
 0x29f   :  { %v420_v50 = vpop.f32.mrf.mxu0 }
 0x2a0   :  { %v421_v54 = vadd.f32 %v474_v51, %v420_v50 }
 0x2a1   :  { %v577_v52 = vpop.f32.mrf.mxu0 }
 0x2a3   :  { %v423_v53 = vpop.f32.mrf.mxu0 }
 0x2a4   :  { %v424_v55 = vadd.f32 %v474_v51, %v423_v53 }
 0x2a5   :  { %v578_v56 = vpop.f32.mrf.mxu0 }
 0x2a6   :  { %v490_v57 = vpack.c.bf16 %v424_v55, %v421_v54 }
 0x2a8   :  { %491 = vst [vmem:[#allocation8] sm:$0xff] %v490_v57  }
 0x2a9   :  { %683 = shalt.err (!%p680_p5)
}
 0x2aa   :  { %448 = dma.vmem_to_hbm [thread:$0]  %s443_s21, 128, %s819_s7, [#allocation4], %s700_s29, %s700_s29, %s701_s30  }
 0x2ab   :  { %696 = dma.done.wait [#allocation4], 128  }
 0x2ac   :  { %697 = vsyncadd [#allocation4], 4294967168 }
 0x2ad   :  { %452 = vsyncpa [#allocation3], 1 }
 0x2ae   :  { %453 = vsyncpa [#allocation6], 1 }
 0x2af   :  { %454 = vsyncpa [#allocation4], 1 }

</bundles_post_ra>
